<compile_context>
chip_gen: v7x
topology: tpu7x:2x2x1
jax: 0.10.0
libtpu: 0.0.40
codegen_flags: <defaults>
</compile_context>

<pallas_src>
import functools

import jax
import jax.numpy as jnp
from jax import lax
from jax.experimental import pallas as pl
from jax.experimental.pallas import tpu as pltpu


def _focal_loss_kernel(logits_ref, tgt_ref, *rest, gamma, use_alpha):
    if use_alpha:
        alpha_ref, out_ref = rest
    else:
        (out_ref,) = rest
        alpha_ref = None

    i = pl.program_id(1)          # arbitrary (reduction) axis

    @pl.when(i == 0)
    def _():
        out_ref[...] = jnp.zeros_like(out_ref)

    x = logits_ref[...].astype(jnp.float32)          # (tn, C)
    t = tgt_ref[...]                                 # (tn, 1) int32; -1 == pad

    # Numerically stable log-sum-exp; never materialize full log-softmax.
    m = jnp.max(x, axis=-1, keepdims=True)
    z = x - m
    lse = jnp.log(jnp.sum(jnp.exp(z), axis=-1, keepdims=True))      # (tn, 1)

    # Fused target "gather": z_t = z[row, t[row]] via masked lane select.
    col = lax.broadcasted_iota(jnp.int32, x.shape, 1)               # (tn, C)
    hit = col == t                                                  # all-false for pads
    z_t = jnp.sum(jnp.where(hit, z, 0.0), axis=-1, keepdims=True)   # (tn, 1)

    ce = jnp.maximum(lse - z_t, 0.0)        # ce = -log_softmax(x)[t] >= 0
    ce = jnp.where(t >= 0, ce, 0.0)         # padded rows contribute exactly 0
    pt = jnp.exp(-ce)
    base = jnp.maximum(1.0 - pt, 0.0)       # guard pow of tiny negative base

    g = float(gamma)
    if g == 0.0:
        w = jnp.ones_like(base)
    elif g.is_integer() and 1.0 <= g <= 8.0:
        # Unrolled integer power keeps log/exp off the EUP for the common
        # gamma=2 case.
        w = base
        for _ in range(int(g) - 1):
            w = w * base
    else:
        w = base ** g
    focal = w * ce                          # (tn, 1)

    if use_alpha:
        focal = focal * alpha_ref[...]      # alpha[target], gathered in wrapper

    # Single cross-sublane reduce per step into the resident (1, 1) output.
    out_ref[...] += jnp.sum(focal, axis=0, keepdims=True)


def _round_up(x, m):
    return (x + m - 1) // m * m


def _tpu_generation():
    """Best-effort (vmem_capacity_bytes, is_v7x) query with safe fallbacks."""
    kind = ""
    try:
        kind = jax.devices()[0].device_kind.lower()
    except Exception:
        pass
    is_v7 = "v7" in kind
    vmem_bytes = None
    try:
        vmem_bytes = int(pltpu.get_tpu_info().vmem_capacity_bytes)
    except Exception:
        pass
    if vmem_bytes is None:
        vmem_bytes = (64 if is_v7 else 128) * 1024 * 1024
    return vmem_bytes, is_v7


def focal_loss(logits, targets, alpha=None, gamma=2.0, reduction="mean",
               *, row_tile=None, num_core_splits=None):
    """logits: (N, C) float32/bfloat16; targets: (N,) int.  Focal loss."""
    N, C = logits.shape
    dtype_bytes = jnp.dtype(logits.dtype).itemsize
    # Sublane packing granularity of the input row tile (f32: 8, bf16: 16, 8-bit: 32).
    sublane = {4: 8, 2: 16, 1: 32}.get(dtype_bytes, 8)

    vmem_bytes, is_v7 = _tpu_generation()
    small_vmem = vmem_bytes <= 96 * 1024 * 1024        # v7x: 64 MiB / TC
    target_tile_bytes = (4 if small_vmem else 8) * 1024 * 1024
    vmem_limit = (40 if small_vmem else 64) * 1024 * 1024

    if num_core_splits is None:
        num_core_splits = 2 if is_v7 else 1            # 2 TCs only on v7x
    P = max(1, int(num_core_splits))

    per_core = _round_up(pl.cdiv(N, P), sublane)
    if row_tile is None:
        # Size by the actual input dtype so bf16 gets 2x rows per DMA; cap so
        # the lane-padded (row_tile, 1) target / alpha_t buffers stay small.
        rt = target_tile_bytes // max(1, C * dtype_bytes)
        rt = max(sublane, min(4096, rt))
        rt = (rt // sublane) * sublane
        row_tile = max(sublane, min(rt, per_core))
    else:
        row_tile = max(sublane, _round_up(int(row_tile), sublane))

    blocks_per_core = pl.cdiv(N, P * row_tile)
    n_pad = P * blocks_per_core * row_tile

    targets = targets.astype(jnp.int32)
    use_alpha = alpha is not None
    if use_alpha:
        if isinstance(alpha, (float, int)):
            alpha_arr = jnp.full((C,), float(alpha), dtype=jnp.float32)
        else:
            alpha_arr = jnp.asarray(alpha, dtype=jnp.float32).reshape(-1)
        if alpha_arr.shape[0] != C:
            raise ValueError(
                f"alpha size {alpha_arr.shape[0]} does not match C {C}")
        alpha_t = alpha_arr[targets]                       # (N,) tiny XLA gather

    if n_pad != N:
        logits = jnp.pad(logits, ((0, n_pad - N), (0, 0)))
        # Pad targets with an out-of-range class so the hit mask is all-false
        # (ce forced to 0 in-kernel via the t >= 0 select).
        targets = jnp.pad(targets, ((0, n_pad - N),), constant_values=-1)
        if use_alpha:
            alpha_t = jnp.pad(alpha_t, ((0, n_pad - N),))
    tgt2d = targets.reshape(n_pad, 1)

    def _block_map(p, i, bpc=blocks_per_core):
        return (p * bpc + i, 0)

    inputs = [logits, tgt2d]
    in_specs = [
        pl.BlockSpec((row_tile, C), _block_map),
        pl.BlockSpec((row_tile, 1), _block_map),
    ]
    if use_alpha:
        inputs.append(alpha_t.reshape(n_pad, 1))
        in_specs.append(pl.BlockSpec((row_tile, 1), _block_map))

    kernel = functools.partial(
        _focal_loss_kernel, gamma=float(gamma), use_alpha=use_alpha)

    partials = pl.pallas_call(
        kernel,
        out_shape=jax.ShapeDtypeStruct((P, 1, 1), jnp.float32),
        grid_spec=pltpu.PrefetchScalarGridSpec(
            num_scalar_prefetch=0,
            grid=(P, blocks_per_core),
            in_specs=in_specs,
            out_specs=pl.BlockSpec((None, 1, 1), lambda p, i: (p, 0, 0)),
        ),
        compiler_params=pltpu.CompilerParams(
            dimension_semantics=("parallel", "arbitrary"),
            vmem_limit_bytes=vmem_limit),
    )(*inputs)

    total = jnp.sum(partials)
    if reduction == "mean":
        return total / jnp.float32(N)
    elif reduction == "sum":
        return total
    else:
        # TODO(synk): reduction='none' (per-sample vector output) not implemented.
        raise NotImplementedError("reduction='none' is not supported by this kernel")


def _focal_loss_ref(logits, targets, alpha=None, gamma=2.0):
    """Pure-JAX reference matching torch semantics (reduction='mean')."""
    logp = jax.nn.log_softmax(logits.astype(jnp.float32), axis=-1)
    ce = -jnp.take_along_axis(logp, targets[:, None].astype(jnp.int32), axis=-1)[:, 0]
    pt = jnp.exp(-ce)
    fl = (1.0 - pt) ** gamma * ce
    if alpha is not None:
        alpha = jnp.asarray(alpha, dtype=jnp.float32)
        fl = alpha[targets] * fl
    return jnp.mean(fl)


if __name__ == "__main__":
    key = jax.random.PRNGKey(0)
    N, C = 16, 32  # small demo shapes: 16 samples, 32 classes
    k1, k2, k3, k4 = jax.random.split(key, 4)
    logits = jax.random.normal(k1, (N, C), dtype=jnp.float32)
    targets = jax.random.randint(k2, (N,), 0, C, dtype=jnp.int32)

    # Deterministic per-class alpha weights (exercises the alpha path).
    alpha = (0.25 + 0.5 * jnp.arange(C, dtype=jnp.float32) / C)
    gamma = 2.0

    out = focal_loss(logits, targets, alpha=alpha, gamma=gamma)
    out = jax.block_until_ready(out)
    ref = _focal_loss_ref(logits, targets, alpha=alpha, gamma=gamma)
    assert jnp.allclose(out, ref, atol=1e-5, rtol=1e-5), (out, ref)

    # Ragged N (exercises padding + target=-1 masking) with no alpha.
    N2 = 13
    logits2 = jax.random.normal(k3, (N2, C), dtype=jnp.float32)
    targets2 = jax.random.randint(k4, (N2,), 0, C, dtype=jnp.int32)
    out2 = focal_loss(logits2, targets2, alpha=None, gamma=gamma)
    out2 = jax.block_until_ready(out2)
    ref2 = _focal_loss_ref(logits2, targets2, alpha=None, gamma=gamma)
    assert jnp.allclose(out2, ref2, atol=1e-5, rtol=1e-5), (out2, ref2)

    print("KERNEL_OK")
</pallas_src>

<mosaic_0001>
module attributes {stable_mosaic.version = 11 : i64} {
  func.func @_focal_loss_kernel(%arg0: i32, %arg1: i32, %arg2: memref<16x32xf32, #tpu.memory_space<vmem>>, %arg3: memref<16x1xi32, #tpu.memory_space<vmem>>, %arg4: memref<16x1xf32, #tpu.memory_space<vmem>>, %arg5: memref<1x1x1xf32, #tpu.memory_space<vmem>>) attributes {dimension_semantics = [#tpu.dimension_semantics<parallel>, #tpu.dimension_semantics<arbitrary>], iteration_bounds = array<i64: 1, 1>, scalar_prefetch = 0 : i64, scratch_operands = 0 : i64, tpu.core_type = #tpu.core_type<tc>, window_params = [{transform_indices = @transform_0, window_bounds = array<i64: 16, 32>}, {transform_indices = @transform_1, window_bounds = array<i64: 16, 1>}, {transform_indices = @transform_2, window_bounds = array<i64: 16, 1>}, {transform_indices = @transform_3, window_bounds = array<i64: 1, 1, 1>}]} {
    %c0_i32 = arith.constant 0 : i32
    %0 = arith.cmpi eq, %arg1, %c0_i32 : i32
    %1 = arith.extui %0 : i1 to i32
    %c0_i32_0 = arith.constant 0 : i32
    %2 = arith.cmpi ne, %1, %c0_i32_0 : i32
    scf.if %2 {
      %cst_22 = arith.constant 0.000000e+00 : f32
      %46 = vector.broadcast %cst_22 : f32 to vector<1x1xf32>
      %c0_23 = arith.constant 0 : index
      %c0_24 = arith.constant 0 : index
      %c0_25 = arith.constant 0 : index
      %47 = vector.load %arg5[%c0_23, %c0_24, %c0_25] : memref<1x1x1xf32, #tpu.memory_space<vmem>>, vector<1x1x1xf32>
      %48 = vector.shape_cast %47 : vector<1x1x1xf32> to vector<1x1xf32>
      %49 = vector.shape_cast %46 : vector<1x1xf32> to vector<1x1x1xf32>
      tpu.vector_store %arg5[%c0_23, %c0_24, %c0_25], %49 {strides = array<i32>} : memref<1x1x1xf32, #tpu.memory_space<vmem>>, vector<1x1x1xf32>,
    } else {
    }
    %c0 = arith.constant 0 : index
    %c0_1 = arith.constant 0 : index
    %3 = vector.load %arg2[%c0, %c0_1] : memref<16x32xf32, #tpu.memory_space<vmem>>, vector<16x32xf32>
    %c0_2 = arith.constant 0 : index
    %c0_3 = arith.constant 0 : index
    %4 = vector.load %arg3[%c0_2, %c0_3] : memref<16x1xi32, #tpu.memory_space<vmem>>, vector<16x1xi32>
    %cst = arith.constant dense<0xFF800000> : vector<16xf32>
    %5 = vector.multi_reduction <maximumf>, %3, %cst [1] : vector<16x32xf32> to vector<16xf32>
    %6 = vector.shape_cast %5 : vector<16xf32> to vector<16x1xf32>
    %7 = vector.broadcast %6 : vector<16x1xf32> to vector<16x32xf32>
    %8 = arith.subf %3, %7 : vector<16x32xf32>
    %9 = math.exp %8 : vector<16x32xf32>
    %cst_4 = arith.constant dense<0.000000e+00> : vector<16xf32>
    %10 = vector.multi_reduction <add>, %9, %cst_4 [1] : vector<16x32xf32> to vector<16xf32>
    %11 = vector.shape_cast %10 : vector<16xf32> to vector<16x1xf32>
    %12 = math.log %11 : vector<16x1xf32>
    %13 = tpu.iota {dimensions = array<i32: 1>} : vector<16x32xi32>
    %14 = vector.broadcast %4 : vector<16x1xi32> to vector<16x32xi32>
    %15 = arith.cmpi eq, %13, %14 : vector<16x32xi32>
    %cst_5 = arith.constant 0.000000e+00 : f32
    %16 = vector.broadcast %cst_5 : f32 to vector<16x32xf32>
    %17 = arith.select %15, %8, %16 : vector<16x32xi1>, vector<16x32xf32>
    %cst_6 = arith.constant dense<0.000000e+00> : vector<16xf32>
    %18 = vector.multi_reduction <add>, %17, %cst_6 [1] : vector<16x32xf32> to vector<16xf32>
    %19 = vector.shape_cast %18 : vector<16xf32> to vector<16x1xf32>
    %20 = arith.subf %12, %19 : vector<16x1xf32>
    %cst_7 = arith.constant 0.000000e+00 : f32
    %21 = vector.broadcast %cst_7 : f32 to vector<16x1xf32>
    %22 = arith.maximumf %20, %21 : vector<16x1xf32>
    %c0_i32_8 = arith.constant 0 : i32
    %23 = vector.broadcast %c0_i32_8 : i32 to vector<16x1xi32>
    %24 = arith.cmpi sge, %4, %23 : vector<16x1xi32>
    %cst_9 = arith.constant 0.000000e+00 : f32
    %25 = vector.broadcast %cst_9 : f32 to vector<16x1xf32>
    %26 = arith.select %24, %22, %25 : vector<16x1xi1>, vector<16x1xf32>
    %cst_10 = arith.constant 0.000000e+00 : f32
    %27 = vector.broadcast %cst_10 : f32 to vector<16x1xf32>
    %28 = arith.subf %27, %26 : vector<16x1xf32>
    %29 = math.exp %28 : vector<16x1xf32>
    %cst_11 = arith.constant 1.000000e+00 : f32
    %30 = vector.broadcast %cst_11 : f32 to vector<16x1xf32>
    %31 = arith.subf %30, %29 : vector<16x1xf32>
    %cst_12 = arith.constant 0.000000e+00 : f32
    %32 = vector.broadcast %cst_12 : f32 to vector<16x1xf32>
    %33 = arith.maximumf %31, %32 : vector<16x1xf32>
    %34 = arith.mulf %33, %33 : vector<16x1xf32>
    %35 = arith.mulf %34, %26 : vector<16x1xf32>
    %c0_13 = arith.constant 0 : index
    %c0_14 = arith.constant 0 : index
    %36 = vector.load %arg4[%c0_13, %c0_14] : memref<16x1xf32, #tpu.memory_space<vmem>>, vector<16x1xf32>
    %37 = arith.mulf %35, %36 : vector<16x1xf32>
    %c0_15 = arith.constant 0 : index
    %c0_16 = arith.constant 0 : index
    %c0_17 = arith.constant 0 : index
    %38 = vector.load %arg5[%c0_15, %c0_16, %c0_17] : memref<1x1x1xf32, #tpu.memory_space<vmem>>, vector<1x1x1xf32>
    %39 = vector.shape_cast %38 : vector<1x1x1xf32> to vector<1x1xf32>
    %cst_18 = arith.constant dense<0.000000e+00> : vector<1xf32>
    %40 = vector.multi_reduction <add>, %37, %cst_18 [0] : vector<16x1xf32> to vector<1xf32>
    %41 = vector.shape_cast %40 : vector<1xf32> to vector<1x1xf32>
    %42 = arith.addf %39, %41 : vector<1x1xf32>
    %c0_19 = arith.constant 0 : index
    %c0_20 = arith.constant 0 : index
    %c0_21 = arith.constant 0 : index
    %43 = vector.load %arg5[%c0_19, %c0_20, %c0_21] : memref<1x1x1xf32, #tpu.memory_space<vmem>>, vector<1x1x1xf32>
    %44 = vector.shape_cast %43 : vector<1x1x1xf32> to vector<1x1xf32>
    %45 = vector.shape_cast %42 : vector<1x1xf32> to vector<1x1x1xf32>
    tpu.vector_store %arg5[%c0_19, %c0_20, %c0_21], %45 {strides = array<i32>} : memref<1x1x1xf32, #tpu.memory_space<vmem>>, vector<1x1x1xf32>,
    return
  }
  func.func @transform_0(%arg0: i32, %arg1: i32) -> (i32, i32) {
    %c1_i32 = arith.constant 1 : i32
    %0 = arith.muli %arg0, %c1_i32 : i32
    %1 = arith.addi %0, %arg1 : i32
    %c0_i32 = arith.constant 0 : i32
    %c0_i32_0 = arith.constant 0 : i32
    return %1, %c0_i32 : i32, i32
  }
  func.func @transform_1(%arg0: i32, %arg1: i32) -> (i32, i32) {
    %c1_i32 = arith.constant 1 : i32
    %0 = arith.muli %arg0, %c1_i32 : i32
    %1 = arith.addi %0, %arg1 : i32
    %c0_i32 = arith.constant 0 : i32
    %c0_i32_0 = arith.constant 0 : i32
    return %1, %c0_i32 : i32, i32
  }
  func.func @transform_2(%arg0: i32, %arg1: i32) -> (i32, i32) {
    %c1_i32 = arith.constant 1 : i32
    %0 = arith.muli %arg0, %c1_i32 : i32
    %1 = arith.addi %0, %arg1 : i32
    %c0_i32 = arith.constant 0 : i32
    %c0_i32_0 = arith.constant 0 : i32
    return %1, %c0_i32 : i32, i32
  }
  func.func @transform_3(%arg0: i32, %arg1: i32) -> (i32, i32, i32) {
    %c0_i32 = arith.constant 0 : i32
    %c0_i32_0 = arith.constant 0 : i32
    %c0_i32_1 = arith.constant 0 : i32
    return %arg0, %c0_i32, %c0_i32_0 : i32, i32, i32
  }
}

</mosaic_0001>

<bundles_post_ra>
// kernel: tpu_custom_call.1
= control target key start
LH: loop header
LB: loop body
LE: loop exit
PB: predicated region body
PF: predicated region fallthrough
CT: control target
= control target key end

     0   :  { %8 = vsyncpa [#allocation3], 0  ;;  %s397_s0 = inlined_call_operand.hbm [shape: f32[16,32], index: 0, kind: input, shape index: {}]   ;;  %s398_s1 = inlined_call_operand.hbm [shape: s32[16,1], index: 1, kind: input, shape index: {}]   ;;  %s399_s2 = inlined_call_operand.hbm [shape: f32[16,1], index: 2, kind: input, shape index: {}]   ;;  %s400_s3 = inlined_call_operand.hbm [shape: f32[1,1,1], index: 3, kind: output, shape index: {}]  }
   0x1   :  { %9 = vsyncpa [#allocation6], 0 }
   0x2   :  { %10 = vsyncpa [#allocation4], 0  ;;  %s297_s12 = smov [#allocation5]   ;;  %s298_s14 = smov [#allocation2]  }
   0x3   :  { %s36_s13 = sshll.u32 %s297_s12, 4  ;;  %s20_s15 = sshll.u32 %s298_s14, 4  ;;  %s37_s13 = int_to_ptr.vmem [resolvable:$true] %s36_s13  ;;  %s325_s15 = int_to_ptr.vmem [resolvable:$true] %s20_s15 }
   0x4   :  { %s203_s18 = scalar_lea.hbm %s398_s1, 256 }
   0x5   :  { %p204_p0 = scmp.ne.s32.totalorder %s398_s1, %s203_s18  ;;  %p207_p1 = scmp.lt.u32.totalorder %s203_s18, %s398_s1 }
   0x7   :  { %p209_p2 = pnand %p207_p1, %p204_p0 }
   0x9   :  { %212 = shalt.err (!%p209_p2)
}
   0xa   :  { %s213_s23 = scalar_lea.vmem %s37_s13, 256  ;;  %p218_p4 = scmp.lt.s32.totalorder %s37_s13, %s37_s13 }
   0xb   :  { %p214_p3 = scmp.ne.s32.totalorder %s37_s13, %s213_s23  ;;  %p219_p5 = scmp.lt.s32.totalorder %s213_s23, %s213_s23 }
   0xd   :  { %p220_p6 = por %p219_p5, %p218_p4 }
   0xf   :  { %p221_p7 = pnand %p220_p6, %p214_p3 }
  0x11   :  { %224 = shalt.err (!%p221_p7)
}
  0x12   :  { %s299_s24 = smov 128   ;;  %s300_s25 = smov 8  }
  0x13   :  { %42 = dma.hbm_to_vmem [thread:$0]  %s398_s1, 256, %s37_s13, [#allocation6], %s299_s24, %s299_s24, %s300_s25  }
  0x14   :  { %s225_s30 = scalar_lea.hbm %s397_s0, 256 }
  0x15   :  { %p226_p8 = scmp.ne.s32.totalorder %s397_s0, %s225_s30  ;;  %p229_p9 = scmp.lt.u32.totalorder %s225_s30, %s397_s0 }
  0x17   :  { %p231_p10 = pnand %p229_p9, %p226_p8 }
  0x19   :  { %234 = shalt.err (!%p231_p10)
}
  0x1a   :  { %s235_s8 = scalar_lea.vmem %s325_s15, 256  ;;  %p240_p12 = scmp.lt.s32.totalorder %s325_s15, %s325_s15 }
  0x1b   :  { %p236_p11 = scmp.ne.s32.totalorder %s325_s15, %s235_s8  ;;  %p241_p13 = scmp.lt.s32.totalorder %s235_s8, %s235_s8 }
  0x1d   :  { %p242_p0 = por %p241_p13, %p240_p12 }
  0x1f   :  { %p243_p1 = pnand %p242_p0, %p236_p11 }
  0x21   :  { %246 = shalt.err (!%p243_p1)
}
  0x22   :  { %26 = dma.hbm_to_vmem [thread:$0]  %s397_s0, 256, %s325_s15, [#allocation3], %s299_s24, %s299_s24, %s300_s25  }
  0x23   :  { %s301_s10 = smov [#allocation7]   ;;  %s247_s14 = scalar_lea.hbm %s399_s2, 256 }
  0x24   :  { %s52_s11 = sshll.u32 %s301_s10, 4  ;;  %p248_p2 = scmp.ne.s32.totalorder %s399_s2, %s247_s14  ;;  %s53_s11 = int_to_ptr.vmem [resolvable:$true] %s52_s11 }
  0x25   :  { %p251_p3 = scmp.lt.u32.totalorder %s247_s14, %s399_s2 }
  0x27   :  { %p253_p4 = pnand %p251_p3, %p248_p2 }
  0x29   :  { %256 = shalt.err (!%p253_p4)
}
  0x2a   :  { %s257_s20 = scalar_lea.vmem %s53_s11, 256  ;;  %p262_p6 = scmp.lt.s32.totalorder %s53_s11, %s53_s11 }
  0x2b   :  { %p258_p5 = scmp.ne.s32.totalorder %s53_s11, %s257_s20  ;;  %p263_p7 = scmp.lt.s32.totalorder %s257_s20, %s257_s20 }
  0x2d   :  { %p264_p8 = por %p263_p7, %p262_p6 }
  0x2f   :  { %p265_p9 = pnand %p264_p8, %p258_p5 }
  0x31   :  { %268 = shalt.err (!%p265_p9)
}
  0x32   :  { %58 = dma.hbm_to_vmem [thread:$0]  %s399_s2, 256, %s53_s11, [#allocation6], %s299_s24, %s299_s24, %s300_s25  }
  0x33   :  { %291 = dma.done.wait [#allocation3], 256  }
  0x34   :  { %292 = vsyncadd [#allocation3], 4294967040 }
  0x35   :  { %293 = dma.done.wait [#allocation6], 512  }
  0x36   :  { %294 = vsyncadd [#allocation6], 4294966784  ;;  %v302_v0 = vmov 0   ;;  %vm84_vm0 = vcmask 261120   ;;  %v80_v1 = vld [vmem:[#allocation2] sm:$0xff]  ;;  %v81_v2 = vld [vmem:[#allocation2 + $0x8] sm:$0xff]  ;;  %v107_v12 = vlaneseq }
  0x37   :  { %189 = vset.pattern.permute.xlu1 %v302_v0  ;;  %190 = vset.pattern.permute.xlu0 %v302_v0  ;;  %v82_v3 = vld [vmem:[#allocation5] sm:$0xff]  ;;  %v85_v4 = vsel %vm84_vm0, %v80_v1, -inf  ;;  %v83_v5 = vld [vmem:[#allocation5 + $0x8] sm:$0xff]  ;;  %v88_v6 = vsel %vm84_vm0, %v81_v2, -inf  ;;  %vm78_vm3 = vcmask 0   ;;  %v303_v25 = vmov 0.0  }
  0x38   :  { %110 = vperm.xlu1 %189, %v82_v3   ;;  %86 = vmax.xlane.f32.xlu0 %v85_v4  ;;  %v108_v15 = vand.u32 127, %v107_v12  ;;  %79 = vst.msk [vmem:[#allocation8] sm:$0x1] %vm78_vm3, %v303_v25  ;;  %vm129_vm4 = vcmp.ge.s32.totalorder %v82_v3, 0  ;;  %vm130_vm5 = vcmp.ge.s32.totalorder %v83_v5, 0  ;;  %v147_v52 = vld [vmem:[#allocation7] sm:$0xff] }
  0x39   :  { %v148_v54 = vld [vmem:[#allocation7 + $0x8] sm:$0xff]  ;;  %vm152_vm6 = vcmask 7168   ;;  %s304_s2 = smov [#allocation8]  }
  0x3a   :  { %s171_s21 = sshll.u32 %s304_s2, 4  ;;  %s172_s21 = int_to_ptr.vmem [resolvable:$true] %s171_s21 }
  0x3b   :  { %s269_s22 = scalar_lea.vmem %s172_s21, 16  ;;  %s273_s23 = scalar_lea.vmem %s172_s21, 32 }
  0x3c   :  { %113 = vperm.xlu1 %189, %v83_v5   ;;  %89 = vmax.xlane.f32.xlu0 %v88_v6  ;;  %p270_p10 = scmp.ne.s32.totalorder %s172_s21, %s269_s22  ;;  %p274_p11 = scmp.lt.s32.totalorder %s172_s21, %s172_s21 }
  0x3d   :  { %p275_p12 = scmp.lt.s32.totalorder %s273_s23, %s269_s22 }
  0x3f   :  { %p276_p13 = por %p275_p12, %p274_p11 }
  0x41   :  { %p277_p0 = pnand %p276_p13, %p270_p10 }
  0xb7   :  { %v111_v14 = vpop.permute.xlu1 %110 }
  0xb8   :  { %vm115_vm1 = vcmp.eq.s32.totalorder %v108_v15, %v111_v14 }
  0xbb   :  { %v114_v17 = vpop.permute.xlu1 %113 }
  0xbc   :  { %vm116_vm2 = vcmp.eq.s32.totalorder %v108_v15, %v114_v17 }
  0xc5   :  { %v87_v7 = vpop.xlane.xlu0 %86 }
  0xc6   :  { %v91_v8 = vsub.f32 %v80_v1, %v87_v7 }
  0xc8   :  { %v93_v9 = vmul.f32 1.442695, %v91_v8  ;;  %v117_v19 = vsel %vm115_vm1, %v91_v8, 0.0 }
  0xc9   :  { %v90_v10 = vpop.xlane.xlu0 %89  ;;  %v119_v21 = vsel %vm84_vm0, %v117_v19, 0.0 }
  0xca   :  { %191 = vpow2.f32 %v93_v9  ;;  %v92_v11 = vsub.f32 %v81_v2, %v90_v10  ;;  %v151_v2 = vld [vmem:[#allocation8] sm:$0x1] }
  0xcc   :  { %v95_v13 = vmul.f32 1.442695, %v92_v11  ;;  %v118_v23 = vsel %vm116_vm2, %v92_v11, 0.0 }
  0xcd   :  { %v122_v24 = vsel %vm84_vm0, %v118_v23, 0.0 }
  0xce   :  { %193 = vpow2.f32 %v95_v13 }
  0xd4   :  { %v192_v16 = vpop.eup %191 }
  0xd5   :  { %v97_v18 = vsel %vm84_vm0, %v192_v16, 0.0 }
  0xd6   :  { %98 = vadd.xlane.f32.xlu0 %v97_v18 }
  0xd8   :  { %v194_v20 = vpop.eup %193 }
  0xd9   :  { %v100_v22 = vsel %vm84_vm0, %v194_v20, 0.0 }
  0xda   :  { %120 = vadd.xlane.f32.xlu0 %v119_v21  ;;  %101 = vadd.xlane.f32.xlu1 %v100_v22 }
  0xde   :  { %123 = vadd.xlane.f32.xlu0 %v122_v24 }
 0x163   :  { %v99_v26 = vpop.xlane.xlu0 %98 }
 0x164   :  { %195 = vlog2.f32 %v99_v26 }
 0x167   :  { %v102_v27 = vpop.xlane.xlu1 %101  ;;  %v121_v29 = vpop.xlane.xlu0 %120 }
 0x168   :  { %197 = vlog2.f32 %v102_v27 }
 0x16b   :  { %v124_v35 = vpop.xlane.xlu0 %123 }
 0x16e   :  { %v196_v28 = vpop.eup %195 }
 0x16f   :  { %v104_v30 = vmul.f32 0.6931472, %v196_v28 }
 0x171   :  { %v125_v31 = vsub.f32 %v104_v30, %v121_v29 }
 0x172   :  { %v198_v32 = vpop.eup %197 }
 0x173   :  { %v127_v33 = vmax.f32 %v125_v31, 0.0  ;;  %v106_v34 = vmul.f32 0.6931472, %v198_v32 }
 0x175   :  { %v131_v36 = vsel %vm129_vm4, %v127_v33, 0.0  ;;  %v126_v37 = vsub.f32 %v106_v34, %v124_v35 }
 0x176   :  { %v133_v38 = vsub.f32 0.0, %v131_v36 }
 0x177   :  { %v128_v39 = vmax.f32 %v126_v37, 0.0 }
 0x178   :  { %v135_v40 = vmul.f32 1.442695, %v133_v38 }
 0x179   :  { %v132_v41 = vsel %vm130_vm5, %v128_v39, 0.0 }
 0x17a   :  { %199 = vpow2.f32 %v135_v40  ;;  %v134_v42 = vsub.f32 0.0, %v132_v41 }
 0x17c   :  { %v137_v43 = vmul.f32 1.442695, %v134_v42 }
 0x17e   :  { %201 = vpow2.f32 %v137_v43 }
 0x184   :  { %v200_v44 = vpop.eup %199 }
 0x185   :  { %v139_v45 = vsub.f32 1.0, %v200_v44 }
 0x187   :  { %v141_v46 = vmax.f32 %v139_v45, 0.0 }
 0x188   :  { %v202_v47 = vpop.eup %201 }
 0x189   :  { %v143_v48 = vmul.f32 %v141_v46, %v141_v46  ;;  %v140_v49 = vsub.f32 1.0, %v202_v47 }
 0x18b   :  { %v145_v50 = vmul.f32 %v143_v48, %v131_v36  ;;  %v142_v51 = vmax.f32 %v140_v49, 0.0 }
 0x18d   :  { %v144_v53 = vmul.f32 %v142_v51, %v142_v51  ;;  %v149_v55 = vmul.f32 %v147_v52, %v145_v50 }
 0x18f   :  { %v146_v56 = vmul.f32 %v144_v53, %v132_v41  ;;  %v153_v58 = vsel %vm152_vm6, %v149_v55, 0.0 }
 0x191   :  { %v150_v57 = vmul.f32 %v148_v54, %v146_v56 }
 0x193   :  { %v154_v59 = vsel %vm152_vm6, %v150_v57, 0.0 }
 0x194   :  { %v155_v60 = vadd.f32 %v154_v59, %v153_v58 }
 0x196   :  { %v156_v61 = vrot.slane %v155_v60, 4 }
 0x198   :  { %v157_v62 = vadd.f32 %v156_v61, %v155_v60 }
 0x19a   :  { %v158_v63 = vrot.slane %v157_v62, 2 }
 0x19c   :  { %v159_v0 = vadd.f32 %v158_v63, %v157_v62 }
 0x19e   :  { %v160_v1 = vrot.slane %v159_v0, 1 }
 0x1a0   :  { %v161_v3 = vadd.f32 %v160_v1, %v159_v0 }
 0x1a2   :  { %v162_v4 = vadd.f32 %v161_v3, %v151_v2 }
 0x1a4   :  { %164 = vst.msk [vmem:[#allocation8] sm:$0x1] %vm78_vm3, %v162_v4 }
 0x1a5   :  { %280 = shalt.err (!%p277_p0)
}
 0x1a6   :  { %s281_s26 = scalar_lea.hbm %s400_s3, 16 }
 0x1a7   :  { %p282_p1 = scmp.ne.s32.totalorder %s400_s3, %s281_s26  ;;  %p285_p2 = scmp.lt.u32.totalorder %s281_s26, %s400_s3 }
 0x1a9   :  { %p287_p3 = pnand %p285_p2, %p282_p1 }
 0x1ab   :  { %290 = shalt.err (!%p287_p3)
}
 0x1ac   :  { %174 = dma.vmem_to_hbm [thread:$0]  %s172_s21, 16, %s400_s3, [#allocation4]  }
 0x1ad   :  { %295 = dma.done.wait [#allocation4], 16  }
 0x1ae   :  { %296 = vsyncadd [#allocation4], 4294967280 }
 0x1af   :  { %178 = vsyncpa [#allocation3], 1 }
 0x1b0   :  { %179 = vsyncpa [#allocation6], 1 }
 0x1b1   :  { %180 = vsyncpa [#allocation4], 1 }

</bundles_post_ra>
